<compile_context>
chip_gen: v7x
topology: tpu7x:2x2x1
jax: 0.10.0
libtpu: 0.0.40
codegen_flags: <defaults>
</compile_context>

<pallas_src>
import functools

import numpy as np
import jax
import jax.numpy as jnp
from jax import lax
from jax.experimental import pallas as pl
from jax.experimental.pallas import tpu as pltpu


# ---------------------------------------------------------------------------
# Pass 1: x-space batch moments, colsum(x) and Gram(x), accumulated per shard.
# Grid = (shards "parallel", batch tiles "arbitrary"); accumulator outputs.
# ---------------------------------------------------------------------------
def stats_kernel(xt_ref, xsum_ref, xgram_ref):
    @pl.when(pl.program_id(1) == 0)
    def _init():
        xsum_ref[...] = jnp.zeros_like(xsum_ref)
        xgram_ref[...] = jnp.zeros_like(xgram_ref)

    xt = xt_ref[...]                                                  # (FE, T)
    # column-sum over the batch (lane) axis in f32; Gram over batch on the MXU
    # (bf16 operands are MXU-native; accumulation forced to f32).
    xsum_ref[...] += jnp.sum(xt.astype(jnp.float32), axis=1, keepdims=True)
    xgram_ref[...] += lax.dot_general(
        xt, xt, (((1,), (1,)), ((), ())), preferred_element_type=jnp.float32)


# ---------------------------------------------------------------------------
# Pass 2: FM second order + collapsed deep tower + sigmoid/clamp epilogue.
# Fully batch-parallel, lane-dense (1, T) output per tile.
# ---------------------------------------------------------------------------
def deepfm_kernel(xt_ref, mt_ref, v_ref, bias_ref, out_ref, *, clamp_eps):
    xt = xt_ref[...].astype(jnp.float32)                              # (FE, T)

    # FM second order: 0.5 * (||sum_f e_f||^2 - sum_f ||e_f||^2), per sample.
    st = jnp.dot(mt_ref[...], xt, preferred_element_type=jnp.float32)  # (E, T)
    fm = 0.5 * (jnp.sum(st * st, axis=0, keepdims=True)
                - jnp.sum(xt * xt, axis=0, keepdims=True))              # (1, T)

    # Deep tower (Linear->BN->Dropout x2) collapsed to one row; the constant
    # term is pre-folded into bias_ref by the wrapper (kept exact in f32).
    deep = jnp.dot(v_ref[...], xt, preferred_element_type=jnp.float32)  # (1, T)

    total = fm + deep + bias_ref[...]
    res = jax.nn.sigmoid(total)
    out_ref[...] = jnp.clip(res, clamp_eps, 1.0 - clamp_eps)


# ---------------------------------------------------------------------------
# Wrapper
# ---------------------------------------------------------------------------
def padded_batch(n, *, tile_n=2048, num_stat_shards=2):
    """Batch padding implied by the tile / pass-1 shard geometry."""
    t, nsh = int(tile_n), int(num_stat_shards)
    n_tiles = -(-int(n) // t)
    return nsh * (-(-n_tiles // nsh)) * t


def deepfm_pallas(emb2t, params, bias, n_valid, embedding_size, *,
                  tile_n=2048, num_stat_shards=2):
    """emb2t: (F*E, N_pad) flattened FM second-order embeddings (already * Xv),
       batch on the lane axis, padded columns zero.  f32 or bf16.
    params: torch-layout weights  w1:(H1,F*E) b1:(H1,) g1/be1:(H1,)
                                  w2:(H2,H1)  b2:(H2,) g2/be2:(H2,)
    bias: (n_valid,) per-sample bias.  Returns (n_valid,) predictions."""
    FE, n_pad = emb2t.shape
    E = int(embedding_size)
    F = FE // E
    t = int(tile_n)
    nsh = int(num_stat_shards)
    assert t % 128 == 0, "batch tile must be a multiple of 128 lanes"
    assert nsh >= 1

    expected = padded_batch(n_valid, tile_n=t, num_stat_shards=nsh)
    if n_pad != expected:            # fallback; callers should pre-pad (cheap)
        emb2t = jnp.pad(emb2t, ((0, 0), (0, expected - n_pad)))
        n_pad = expected
    n_tiles = n_pad // t
    tiles_per_shard = n_tiles // nsh

    cparams = dict(vmem_limit_bytes=32 * 1024 * 1024)  # safe on v5e/v6e/v7x

    # ---- pass 1: stream x once, accumulate colsum(x) / Gram(x) per shard ----
    xsum_s, xgram_s = pl.pallas_call(
        stats_kernel,
        grid=(nsh, tiles_per_shard),
        in_specs=[
            pl.BlockSpec((FE, t), lambda s, i: (0, s * tiles_per_shard + i)),
        ],
        out_specs=[
            pl.BlockSpec((FE, 1), lambda s, i: (s, 0)),    # per-shard accum
            pl.BlockSpec((FE, FE), lambda s, i: (s, 0)),   # per-shard accum
        ],
        out_shape=(jax.ShapeDtypeStruct((nsh * FE, 1), jnp.float32),
                   jax.ShapeDtypeStruct((nsh * FE, FE), jnp.float32)),
        compiler_params=pltpu.CompilerParams(
            dimension_semantics=("parallel", "arbitrary"), **cparams),
    )(emb2t)

    xsum = jnp.sum(xsum_s.reshape(nsh, FE), axis=0)                  # (FE,)
    xgram = jnp.sum(xgram_s.reshape(nsh, FE, FE), axis=0)            # (FE, FE)

    # ---- glue: fold both train-mode BatchNorms + the whole deep tower ----
    # (b1, b2, beta1 cancel exactly under batch-statistics normalisation.)
    w1 = params["w1"].astype(jnp.float32)                            # (H1, FE)
    w2 = params["w2"].astype(jnp.float32)                            # (H2, H1)
    nf = jnp.float32(n_valid)
    xbar = xsum / nf                                                 # E[x]
    cx = xgram / nf - jnp.outer(xbar, xbar)                          # Cov(x)
    cy = w1 @ cx @ w1.T                                              # Cov(W1 x)
    var1 = jnp.diag(cy)
    sc1 = params["g1"] * lax.rsqrt(var1 + 1e-5)                      # gamma1/std1
    a = cy * sc1[:, None] * sc1[None, :]                             # D C D
    var2 = jnp.sum((w2 @ a) * w2, axis=1)
    sc2 = params["g2"] * lax.rsqrt(var2 + 1e-5)                      # gamma2/std2
    vrow = (sc1 * (w2.T @ sc2)) @ w1                                 # (FE,)
    deep_const = jnp.sum(params["be2"]) - vrow @ xbar                # scalar

    # constant field-sum matrix (E, FE): sums the E-dim across fields.
    mt = jnp.tile(jnp.eye(E, dtype=jnp.float32), (1, F))

    bias_row = jnp.asarray(bias, jnp.float32).reshape(1, -1)
    if bias_row.shape[1] != n_pad:
        bias_row = jnp.pad(bias_row, ((0, 0), (0, n_pad - bias_row.shape[1])))
    bias_row = bias_row + deep_const                 # fold constant (exact, f32)

    kern = functools.partial(deepfm_kernel, clamp_eps=0.005)

    # ---- pass 2: fully parallel main kernel, lane-dense (1, N) output ----
    out = pl.pallas_call(
        kern,
        grid=(n_tiles,),
        in_specs=[
            pl.BlockSpec((FE, t), lambda i: (0, i)),     # streamed embeddings
            pl.BlockSpec((E, FE), lambda i: (0, 0)),     # field-sum matrix
            pl.BlockSpec((1, FE), lambda i: (0, 0)),     # collapsed deep row
            pl.BlockSpec((1, t), lambda i: (0, i)),      # per-sample bias+const
        ],
        out_specs=pl.BlockSpec((1, t), lambda i: (0, i)),
        out_shape=jax.ShapeDtypeStruct((1, n_pad), jnp.float32),
        compiler_params=pltpu.CompilerParams(
            dimension_semantics=("parallel",), **cparams),
    )(emb2t, mt, vrow.reshape(1, FE), bias_row)

    return out[0, :n_valid]


# ---------------------------------------------------------------------------
# Glue: per-field fm_second_order embeddings / linears, scaled by Xv, built
# DIRECTLY in the transposed lane-dense (F*E, n_pad) layout (slab written once;
# padding applied to the tiny Xi/Xv inputs so padded columns are exactly zero).
# ---------------------------------------------------------------------------
def build_field_embeddings_t(Xi, Xv, fm_params, feature_sizes,
                             continuous_field_size, n_pad, dtype=jnp.float32):
    n = Xi.shape[0]
    if n_pad > n:
        Xi = jnp.pad(Xi, ((0, n_pad - n), (0, 0), (0, 0)))
        Xv = jnp.pad(Xv, ((0, n_pad - n), (0, 0)))
    xv_t = Xv.T.astype(jnp.float32)                                  # (F, n_pad)
    slabs = []
    for i, _ in enumerate(feature_sizes):
        if i < continuous_field_size:
            w = fm_params["lin_w"][i]                                # (E, fs)
            b = fm_params["lin_b"][i]                                # (E,)
            e = w @ Xi[:, i, :].astype(jnp.float32).T + b[:, None]   # (E, n_pad)
        else:
            tbl_t = fm_params["emb"][i - continuous_field_size].T    # (E, fs)
            e = jnp.take(tbl_t, Xi[:, i, 0].astype(jnp.int32), axis=1)
        slabs.append(e * xv_t[i][None, :])
    return jnp.concatenate(slabs, axis=0).astype(dtype)              # (F*E, n_pad)


# ---------------------------------------------------------------------------
# Plain-JAX reference mirroring the PyTorch forward (training-mode BatchNorm).
# ---------------------------------------------------------------------------
def reference_forward(emb3, params, bias):
    hp = lax.Precision.HIGHEST
    e = emb3
    s = e.sum(1)
    fm2 = 0.5 * (s * s - (e * e).sum(1))
    x = e.reshape(e.shape[0], -1)

    h = jnp.dot(x, params["w1"].T, precision=hp) + params["b1"]
    mu = h.mean(0); var = ((h - mu) ** 2).mean(0)
    h = (h - mu) / jnp.sqrt(var + 1e-5) * params["g1"] + params["be1"]

    h = jnp.dot(h, params["w2"].T, precision=hp) + params["b2"]
    mu = h.mean(0); var = ((h - mu) ** 2).mean(0)
    h = (h - mu) / jnp.sqrt(var + 1e-5) * params["g2"] + params["be2"]

    total = fm2.sum(1) + h.sum(1) + bias
    return jnp.clip(jax.nn.sigmoid(total), 0.005, 1.0 - 0.005)


if __name__ == "__main__":
    # Small deterministic configuration consistent with the module's __init__.
    feature_sizes = [1, 1, 1, 10, 12, 8, 6, 16]   # 3 continuous + 5 categorical
    continuous_field_size = 3
    F = len(feature_sizes)
    E = 4                                          # embedding_size
    H1, H2 = 128, 128                              # hidden_dims default [128, 128]
    N = 6000                                       # batch
    TILE = 2048                                    # >= 2048 per perf review
    NSH = 2                                        # pass-1 shards (v7x megacore)

    key = jax.random.PRNGKey(0)
    keys = iter(jax.random.split(key, 64))

    fm_params = {
        "lin_w": [0.1 * jax.random.normal(next(keys), (E, feature_sizes[i]), jnp.float32)
                  for i in range(continuous_field_size)],
        "lin_b": [0.1 * jax.random.normal(next(keys), (E,), jnp.float32)
                  for _ in range(continuous_field_size)],
        "emb": [0.1 * jax.random.normal(next(keys), (feature_sizes[i], E), jnp.float32)
                for i in range(continuous_field_size, F)],
    }
    params = {
        "w1": 0.1 * jax.random.normal(next(keys), (H1, F * E), jnp.float32),
        "b1": 0.1 * jax.random.normal(next(keys), (H1,), jnp.float32),
        "g1": 1.0 + 0.1 * jax.random.normal(next(keys), (H1,), jnp.float32),
        "be1": 0.1 * jax.random.normal(next(keys), (H1,), jnp.float32),
        "w2": 0.1 * jax.random.normal(next(keys), (H2, H1), jnp.float32),
        "b2": 0.1 * jax.random.normal(next(keys), (H2,), jnp.float32),
        "g2": 1.0 + 0.1 * jax.random.normal(next(keys), (H2,), jnp.float32),
        "be2": 0.1 * jax.random.normal(next(keys), (H2,), jnp.float32),
    }

    # Inputs: Xi (N, F, 1) (continuous values / categorical indices), Xv (N, F).
    xi_cont = jax.random.normal(next(keys), (N, continuous_field_size, 1), jnp.float32)
    xi_cat = jnp.stack(
        [jax.random.randint(next(keys), (N, 1), 0, feature_sizes[i])
         for i in range(continuous_field_size, F)], axis=1).astype(jnp.float32)
    Xi = jnp.concatenate([xi_cont, xi_cat], axis=1)
    Xv = jax.random.uniform(next(keys), (N, F), jnp.float32)

    # The PyTorch forward draws a fresh random bias each call; deterministic here.
    bias = jax.random.normal(next(keys), (N,), jnp.float32)

    n_pad = padded_batch(N, tile_n=TILE, num_stat_shards=NSH)
    emb2t = build_field_embeddings_t(Xi, Xv, fm_params, feature_sizes,
                                     continuous_field_size, n_pad)   # f32 slab

    result = deepfm_pallas(emb2t, params, bias, N, E,
                           tile_n=TILE, num_stat_shards=NSH)
    result = jax.block_until_ready(result)

    # Reference (training-mode BatchNorm) on the same f32 embeddings.
    emb3 = emb2t[:, :N].T.reshape(N, F, E)
    ref = reference_forward(emb3, params, bias)
    assert result.shape == (N,)
    err = float(np.max(np.abs(np.asarray(result) - np.asarray(ref))))
    assert np.allclose(np.asarray(result), np.asarray(ref),
                       atol=1e-3, rtol=1e-3), err

    # bf16-streamed variant: halves HBM bytes on the only large operand.
    # Looser tolerance: bf16 rounding of x is amplified by the 1/sqrt(var)
    # BatchNorm scales folded into the deep row (still a coarse sanity check).
    result_bf16 = deepfm_pallas(emb2t.astype(jnp.bfloat16), params, bias, N, E,
                                tile_n=TILE, num_stat_shards=NSH)
    result_bf16 = jax.block_until_ready(result_bf16)
    err_bf16 = float(np.max(np.abs(np.asarray(result_bf16, dtype=np.float32)
                                   - np.asarray(ref))))
    assert err_bf16 < 0.1, err_bf16

    print("KERNEL_OK")
</pallas_src>

<mosaic_0001>
module attributes {stable_mosaic.version = 11 : i64} {
  func.func @stats_kernel(%arg0: i32, %arg1: i32, %arg2: memref<32x2048xf32, #tpu.memory_space<vmem>>, %arg3: memref<32x1xf32, #tpu.memory_space<vmem>>, %arg4: memref<32x32xf32, #tpu.memory_space<vmem>>) attributes {dimension_semantics = [#tpu.dimension_semantics<parallel>, #tpu.dimension_semantics<arbitrary>], iteration_bounds = array<i64: 2, 2>, scalar_prefetch = 0 : i64, scratch_operands = 0 : i64, tpu.core_type = #tpu.core_type<tc>, window_params = [{transform_indices = @transform_0, window_bounds = array<i64: 32, 2048>}, {transform_indices = @transform_1, window_bounds = array<i64: 32, 1>}, {transform_indices = @transform_2, window_bounds = array<i64: 32, 32>}]} {
    %c0_i32 = arith.constant 0 : i32
    %0 = arith.cmpi eq, %arg1, %c0_i32 : i32
    %1 = arith.extui %0 : i1 to i32
    %c0_i32_0 = arith.constant 0 : i32
    %2 = arith.cmpi ne, %1, %c0_i32_0 : i32
    scf.if %2 {
      %cst_11 = arith.constant 0.000000e+00 : f32
      %13 = vector.broadcast %cst_11 : f32 to vector<32x1xf32>
      %c0_12 = arith.constant 0 : index
      %c0_13 = arith.constant 0 : index
      %14 = vector.load %arg3[%c0_12, %c0_13] : memref<32x1xf32, #tpu.memory_space<vmem>>, vector<32x1xf32>
      tpu.vector_store %arg3[%c0_12, %c0_13], %13 {strides = array<i32>} : memref<32x1xf32, #tpu.memory_space<vmem>>, vector<32x1xf32>,
      %cst_14 = arith.constant 0.000000e+00 : f32
      %15 = vector.broadcast %cst_14 : f32 to vector<32x32xf32>
      %c0_15 = arith.constant 0 : index
      %c0_16 = arith.constant 0 : index
      %16 = vector.load %arg4[%c0_15, %c0_16] : memref<32x32xf32, #tpu.memory_space<vmem>>, vector<32x32xf32>
      tpu.vector_store %arg4[%c0_15, %c0_16], %15 {strides = array<i32>} : memref<32x32xf32, #tpu.memory_space<vmem>>, vector<32x32xf32>,
    } else {
    }
    %c0 = arith.constant 0 : index
    %c0_1 = arith.constant 0 : index
    %3 = vector.load %arg2[%c0, %c0_1] : memref<32x2048xf32, #tpu.memory_space<vmem>>, vector<32x2048xf32>
    %c0_2 = arith.constant 0 : index
    %c0_3 = arith.constant 0 : index
    %4 = vector.load %arg3[%c0_2, %c0_3] : memref<32x1xf32, #tpu.memory_space<vmem>>, vector<32x1xf32>
    %cst = arith.constant dense<0.000000e+00> : vector<32xf32>
    %5 = vector.multi_reduction <add>, %3, %cst [1] : vector<32x2048xf32> to vector<32xf32>
    %6 = vector.shape_cast %5 : vector<32xf32> to vector<32x1xf32>
    %7 = arith.addf %4, %6 : vector<32x1xf32>
    %c0_4 = arith.constant 0 : index
    %c0_5 = arith.constant 0 : index
    %8 = vector.load %arg3[%c0_4, %c0_5] : memref<32x1xf32, #tpu.memory_space<vmem>>, vector<32x1xf32>
    tpu.vector_store %arg3[%c0_4, %c0_5], %7 {strides = array<i32>} : memref<32x1xf32, #tpu.memory_space<vmem>>, vector<32x1xf32>,
    %c0_6 = arith.constant 0 : index
    %c0_7 = arith.constant 0 : index
    %9 = vector.load %arg4[%c0_6, %c0_7] : memref<32x32xf32, #tpu.memory_space<vmem>>, vector<32x32xf32>
    %cst_8 = arith.constant dense<0.000000e+00> : vector<32x32xf32>
    %10 = tpu.matmul %3, %3, %cst_8 {dimension_numbers = #tpu.dot_dimension_numbers<[1], [1], [0], [0], [0, 0, 1, 0], [], []>} : vector<32x2048xf32>, vector<32x2048xf32>, vector<32x32xf32> -> vector<32x32xf32>
    %11 = arith.addf %9, %10 : vector<32x32xf32>
    %c0_9 = arith.constant 0 : index
    %c0_10 = arith.constant 0 : index
    %12 = vector.load %arg4[%c0_9, %c0_10] : memref<32x32xf32, #tpu.memory_space<vmem>>, vector<32x32xf32>
    tpu.vector_store %arg4[%c0_9, %c0_10], %11 {strides = array<i32>} : memref<32x32xf32, #tpu.memory_space<vmem>>, vector<32x32xf32>,
    return
  }
  func.func @transform_0(%arg0: i32, %arg1: i32) -> (i32, i32) {
    %c2_i32 = arith.constant 2 : i32
    %0 = arith.muli %arg0, %c2_i32 : i32
    %1 = arith.addi %0, %arg1 : i32
    %c0_i32 = arith.constant 0 : i32
    %c0_i32_0 = arith.constant 0 : i32
    return %c0_i32, %1 : i32, i32
  }
  func.func @transform_1(%arg0: i32, %arg1: i32) -> (i32, i32) {
    %c0_i32 = arith.constant 0 : i32
    %c0_i32_0 = arith.constant 0 : i32
    return %arg0, %c0_i32 : i32, i32
  }
  func.func @transform_2(%arg0: i32, %arg1: i32) -> (i32, i32) {
    %c0_i32 = arith.constant 0 : i32
    %c0_i32_0 = arith.constant 0 : i32
    return %arg0, %c0_i32 : i32, i32
  }
}

</mosaic_0001>

<bundles_post_ra>
// kernel: tpu_custom_call.1
= control target key start
LH: loop header
LB: loop body
LE: loop exit
PB: predicated region body
PF: predicated region fallthrough
CT: control target
= control target key end

     0   :  { %8 = vsyncpa [#allocation3], 0  ;;  %s1997_s0 = inlined_call_operand.hbm [shape: f32[32,8192], index: 0, kind: input, shape index: {}]   ;;  %s1998_s1 = inlined_call_operand.vmem [shape: f32[64,1], index: 1, kind: output, shape index: {0}]   ;;  %s1999_s2 = inlined_call_operand.vmem [shape: f32[64,32], index: 2, kind: output, shape index: {1}]  }
   0x1   :  { %10 = vsyncpa [#allocation3 + $0x1], 0  ;;  %s1444_s9 = smov 0   ;;  %s1446_s10 = smov 0  }
   0x2   :  { %s1448_s11 = smov 0   ;;  %s1450_s12 = smov 0  }
   0x3   :  { %s1452_s13 = smov 0   ;;  %s1454_s14 = smov 0  }
   0x4   :  { %s1456_s15 = smov 0   ;;  %s1458_s16 = smov 0  }
   0x5 LB: > { %s1167_s17 = sadd.s32 4294967295, %s1422_s16   ;;  %s25_s18 = sadd.s32 1, %s1414_s14  ;;  %s1422_s16 = sphi %s1458_s16, %s16_s16   ;;  %s1418_s15 = sphi %s1456_s15, %s2010_s15   ;;  %s1414_s14 = sphi %s1454_s14, %s2009_s14   ;;  %s1410_s13 = sphi %s1452_s13, %s2008_s13   ;;  %s1406_s12 = sphi %s1450_s12, %s2007_s12   ;;  %s1402_s11 = sphi %s1448_s11, %s2006_s11   ;;  %s1398_s10 = sphi %s1446_s10, %s2005_s10   ;;  %s1394_s9 = sphi %s1444_s9, %s2004_s9  }
   0x6   : > { %p26_p0 = scmp.ge.s32.totalorder %s25_s18, 2  ;;  %s28_s19 = sadd.s32 1, %s1418_s15 }
   0x7   : > { %s1169_s20 = sshll.u32 %s1418_s15, 1  ;;  %s39_s21 = sadd.s32 1, %s1402_s11 }
   0x8   : > { %s2012_s18 = smov (%p26_p0, %s25_s18), 0  ;;  %s2014_s19 = smov (!%p26_p0, %s28_s19), %s1418_s15 }
   0x9   : > { %s33_s22 = sadd.s32 %s1414_s14, %s1169_s20  ;;  %p46_p1 = scmp.ne.s32.totalorder %s1402_s11, %s1398_s10 }
   0xa   : > { %p30_p2 = scmp.ge.s32.totalorder %s2014_s19, 2  ;;  %p47_p3 = scmp.eq.s32.totalorder %s1422_s16, 0 }
   0xb   : > { %p52_p4 = scmp.ne.s32.totalorder %s1398_s10, %s1394_s9  ;;  %p53_p5 = scmp.eq.s32.totalorder %s1167_s17, 0 }
   0xc   : > { %s2016_s19 = smov (%p30_p2, %s2014_s19), 0  ;;  %p1497_p6 = por %p47_p3, %p46_p1 }
   0xd   : > { %p1501_p7 = por %p53_p5, %p52_p4  ;;  %s1170_s25 = sshll.u32 %s2016_s19, 1 }
   0xe   : > { %s35_s26 = sadd.s32 %s1170_s25, %s2012_s18  ;;  %p1257_p8 = scmp.lt.s32.totalorder %s1422_s16, 4 }
   0xf   : > { %s36_s27 = ssub.s32 %s33_s22, %s35_s26  ;;  %s128_s28 = sand.u32 1, %s1402_s11  }
  0x10   : > { %p37_p9 = scmp.eq.s32.totalorder %s36_s27, 0  ;;  %s1173_s29 = sshll.u32 %s128_s28, 9 }
  0x11   : > { %s1186_s30 = sshll.u32 %s33_s22, 11  ;;  %s132_s7 = scalar_lea.vmem [#allocation2], %s1173_s29 }
  0x12   : > { %s1510_s3 = scalar_select %p37_p9, %s1402_s11, %s39_s21  }
  0x13   : > { %s1515_s6 = scalar_lea.hbm %s1997_s0, %s1186_s30  ;;  %s141_s8 = sshll.u32 %s132_s7, 4  ;;  %s1523_s8 = int_to_ptr.vmem [resolvable:$true] %s141_s8 }
  0x14   : > { %p1519_p10 = pnand %p1257_p8, %p1497_p6  ;;  %s1526_s17 = scalar_lea.sflag [#allocation3], %s128_s28 }
  0x15   : > { %s1326_s20 = scalar_lea.hbm %s1515_s6, 8192  ;;  %s1331_s23 = scalar_lea.hbm %s1997_s0, 32768 }
  0x16   : > { %p1327_p12 = scmp.ne.s32.totalorder %s1515_s6, %s1326_s20  ;;  %p1328_p13 = pneg %p1519_p10 }
  0x17   : > { %p1332_p2 = scmp.lt.u32.totalorder %s1515_s6, %s1997_s0  ;;  %p1333_p3 = scmp.lt.u32.totalorder %s1331_s23, %s1326_s20 }
  0x18   : > { %p1329_p0 = pnand %p1328_p13, %p1327_p12  ;;  %p1335_p5 = scmp.lt.u32.totalorder %s1326_s20, %s1515_s6 }
  0x19   : > { %p1334_p4 = por %p1333_p3, %p1332_p2 }
  0x1a   : > { %p1330_p1 = pneg %p1329_p0 }
  0x1b   : > { %p1336_p6 = por %p1335_p5, %p1334_p4 }
  0x1d   : > { %p1337_p8 = pnand %p1336_p6, %p1330_p1 }
  0x1f   : > { %1340 = shalt.err (!%p1337_p8)
}
  0x20   : > { %s1341_s27 = scalar_lea.vmem %s1523_s8, 8192  ;;  %s1424_s28 = smov [#allocation2]  }
  0x21   : > { %p1342_p9 = scmp.ne.s32.totalorder %s1523_s8, %s1341_s27  ;;  %s1346_s29 = sshll.u32 %s1424_s28, 4  ;;  %s1347_s29 = int_to_ptr.vmem [resolvable:$false] %s1346_s29 }
  0x22   : > { %s1348_s30 = scalar_lea.vmem %s1347_s29, 16384  ;;  %p1349_p11 = scmp.lt.s32.totalorder %s1523_s8, %s1347_s29 }
  0x23   : > { %p1344_p12 = pnand %p1342_p9, %p1328_p13  ;;  %p1350_p2 = scmp.lt.s32.totalorder %s1348_s30, %s1341_s27 }
  0x25   : > { %p1345_p0 = pneg %p1344_p12  ;;  %p1351_p3 = por %p1350_p2, %p1349_p11 }
  0x27   : > { %p1352_p4 = pnand %p1351_p3, %p1345_p0 }
  0x29   : > { %1355 = shalt.err (!%p1352_p4)
}
  0x2a   : > { %s1425_s4 = smov 8192   ;;  %s1426_s5 = smov 2048  }
  0x2b   : > { %s1427_s7 = smov 128   ;;  %p149_p13 = scmp.lt.s32.totalorder %s1422_s16, 5 }
  0x2c   : > { %1256 = dma.hbm_to_vmem [thread:$0]  (!%p1519_p10), %s1515_s6, 8192, %s1523_s8, %s1526_s17, %s1425_s4, %s1426_s5, %s1427_s7  }
  0x2d   : > { %p2003_p1 = scmp.ge.s32.totalorder %s1422_s16, 1 }
  0x2f   : > { %p150_p5 = pnand %p2003_p1, %p149_p13 }
  0x30   : > { %s155_s20 = sand.u32 (!%p150_p5), 1, %s1398_s10  }
  0x31   : > { %153 = sbr.rel (%p150_p5) target bundleno = 366 (0x16e), region = 24  ;;  %s1178_s21 = sshll.u32 (!%p150_p5), %s155_s20, 9 }
  0x32   : > { %s156_s22 = scalar_lea.sflag (!%p150_p5), [#allocation3], %s155_s20  ;;  %s1558_s23 = scalar_lea.vmem (!%p150_p5), [#allocation2], %s1178_s21 }
  0x38   : > { %1389 = dma.done.wait (%p1501_p7), %s156_s22, 8192  }
  0x39   : > { %1391 = vsyncadd (%p1501_p7), %s156_s22, 4294959104  ;;  %s1179_s25 = sshll.u32 %s1410_s13, 2  ;;  %p1183_p10 = scmp.ne.s32.totalorder %s1406_s12, 0 }
  0x3a   : > { %p189_p11 = scmp.lt.s32.totalorder %s1179_s25, 7  ;;  %vm204_vm0 = vcmask (!%p1183_p10), 7168   ;;  %vm209_vm1 = vcmask (!%p1183_p10), 261120   ;;  %v1428_v0 = vmov (!%p1183_p10), 0.0  }
  0x3b   : > { %203 = sbr.rel (%p1183_p10) target bundleno = 67 (0x43), region = 32 }
  0x3c   : > { %s2018_s25 = smov (!%p189_p11, %s1179_s25), 7 }
  0x3d   : > { %s1180_s6 = sshll.u32 %s2018_s25, 3 }
  0x3e   : > { %s1568_s17 = scalar_lea.vmem %s1998_s1, %s1180_s6  ;;  %s1573_s28 = scalar_lea.vmem %s1999_s2, %s1180_s6 }
  0x3f   : > { %205 = vst.msk [vmem:[%s1568_s17] sm:$0xff] (!%p1183_p10), %vm204_vm0, %v1428_v0  ;;  %206 = vst.msk [vmem:[%s1568_s17 + $0x8] sm:$0xff] (!%p1183_p10), %vm204_vm0, %v1428_v0 }
  0x40   : > { %210 = vst.msk [vmem:[%s1573_s28] sm:$0xff] (!%p1183_p10), %vm209_vm1, %v1428_v0  ;;  %211 = vst.msk [vmem:[%s1573_s28 + $0x8] sm:$0xff] (!%p1183_p10), %vm209_vm1, %v1428_v0 }
  0x41   : > { %207 = vst.msk [vmem:[%s1568_s17 + $0x10] sm:$0xff] (!%p1183_p10), %vm204_vm0, %v1428_v0  ;;  %208 = vst.msk [vmem:[%s1568_s17 + $0x18] sm:$0xff] (!%p1183_p10), %vm204_vm0, %v1428_v0 }
  0x42   : > { %212 = vst.msk [vmem:[%s1573_s28 + $0x10] sm:$0xff] %vm209_vm1, %v1428_v0  ;;  %213 = vst.msk [vmem:[%s1573_s28 + $0x18] sm:$0xff] %vm209_vm1, %v1428_v0 }
  0x43 PF: > { %v215_v1 = vld [vmem:[%s1558_s23 + $0x8] sm:$0xff]  ;;  %v1589_v3 = vld [vmem:[%s1558_s23] sm:$0xff]  ;;  %v217_v7 = vld [vmem:[%s1558_s23 + $0x18] sm:$0xff]  ;;  %vm354_vm2 = vcmask 7168   ;;  %vm1047_vm3 = vcmask 261120  }
  0x44   : > { %v1586_v2 = vld [vmem:[%s1558_s23 + $0x88] sm:$0xff]  ;;  %v1593_v5 = vld [vmem:[%s1558_s23 + $0x80] sm:$0xff]  ;;  %v282_v6 = vadd.f32 %v215_v1, %v1589_v3  ;;  %v1598_v8 = vld [vmem:[%s1558_s23 + $0x98] sm:$0xff]  ;;  %427 = vmatprep.mubr.f32.mxu0 %v215_v1  ;;  %512 = vmatprep.mubr.f32.mxu1 %v217_v7 }
  0x45   : > { %v1187_v4 = vpack.c.bf16 %v1586_v2, %v215_v1  ;;  %v299_v9 = vadd.f32 %v1586_v2, %v1593_v5  ;;  %v1189_v10 = vpack.c.bf16 %v1593_v5, %v1589_v3  ;;  %v1195_v11 = vpack.c.bf16 %v1598_v8, %v217_v7  ;;  %v1606_v12 = vld [vmem:[%s1558_s23 + $0x10] sm:$0xff]  ;;  %v1615_v16 = vld [vmem:[%s1558_s23 + $0x108] sm:$0xff]  ;;  %v1624_v20 = vld [vmem:[%s1558_s23 + $0x100] sm:$0xff] }
  0x46   : > { %v1609_v13 = vld [vmem:[%s1558_s23 + $0x90] sm:$0xff]  ;;  %v283_v14 = vadd.f32 %v282_v6, %v1606_v12  ;;  %v1618_v17 = vld [vmem:[%s1558_s23 + $0x188] sm:$0xff]  ;;  %v1627_v21 = vld [vmem:[%s1558_s23 + $0x180] sm:$0xff]  ;;  %v316_v24 = vadd.f32 %v1615_v16, %v1624_v20 }
  0x47   : > { %1188 = vmatprep.subr.bf16.mxu0 %v1187_v4  ;;  %v1197_v15 = vpack.c.bf16 %v1609_v13, %v1606_v12  ;;  %1196 = vmatprep.subr.bf16.mxu1 %v1195_v11  ;;  %v300_v18 = vadd.f32 %v299_v9, %v1609_v13  ;;  %v1191_v19 = vpack.c.bf16 %v1618_v17, %v1615_v16  ;;  %v1630_v22 = vld [vmem:[%s1558_s23 + $0x118] sm:$0xff]  ;;  %v1640_v27 = vld [vmem:[%s1558_s23 + $0x110] sm:$0xff]  ;;  %v1646_v29 = vld [vmem:[%s1558_s23 + $0x20] sm:$0xff] }
  0x48   : > { %1190 = vmatpush1.bf16.xpose.msra.mxu0 %v1189_v10  ;;  %v284_v23 = vadd.f32 %v283_v14, %v217_v7  ;;  %v333_v25 = vadd.f32 %v1618_v17, %v1627_v21  ;;  %v1637_v26 = vld [vmem:[%s1558_s23 + $0x198] sm:$0xff]  ;;  %v1643_v28 = vld [vmem:[%s1558_s23 + $0x190] sm:$0xff]  ;;  %v1652_v32 = vld [vmem:[%s1558_s23 + $0x28] sm:$0xff]  ;;  %v317_v36 = vadd.f32 %v316_v24, %v1640_v27  ;;  %v1193_v41 = vpack.c.bf16 %v1627_v21, %v1624_v20 }
  0x49   : > { %1198 = vmatpush1.bf16.xpose.msra.mxu1 %v1197_v15  ;;  %v301_v30 = vadd.f32 %v300_v18, %v1598_v8  ;;  %1192 = vmatprep.subr.bf16.mxu0 %v1191_v19  ;;  %v1199_v31 = vpack.c.bf16 %v1637_v26, %v1630_v22  ;;  %v1655_v33 = vld [vmem:[%s1558_s23 + $0xa8] sm:$0xff]  ;;  %v1658_v34 = vld [vmem:[%s1558_s23 + $0xa0] sm:$0xff]  ;;  %v1664_v38 = vld [vmem:[%s1558_s23 + $0x38] sm:$0xff]  ;;  %v1201_v42 = vpack.c.bf16 %v1643_v28, %v1640_v27 }
  0x4a   : > { %v285_v35 = vadd.f32 %v284_v23, %v1646_v29  ;;  %v334_v37 = vadd.f32 %v333_v25, %v1643_v28  ;;  %v1667_v39 = vld [vmem:[%s1558_s23 + $0xb8] sm:$0xff]  ;;  %v318_v43 = vadd.f32 %v317_v36, %v1630_v22  ;;  %v1203_v46 = vpack.c.bf16 %v1655_v33, %v1652_v32  ;;  %v1681_v48 = vld [vmem:[%s1558_s23 + $0x30] sm:$0xff]  ;;  %v1686_v50 = vld [vmem:[%s1558_s23 + $0x120] sm:$0xff] }
  0x4b   : > { %v302_v40 = vadd.f32 %v301_v30, %v1658_v34  ;;  %1200 = vmatprep.subr.bf16.mxu1 %v1199_v31  ;;  %v1211_v49 = vpack.c.bf16 %v1667_v39, %v1664_v38  ;;  %v1689_v51 = vld [vmem:[%s1558_s23 + $0x1a0] sm:$0xff]  ;;  %v1692_v52 = vld [vmem:[%s1558_s23 + $0xb0] sm:$0xff]  ;;  %v1699_v57 = vld [vmem:[%s1558_s23 + $0x128] sm:$0xff]  ;;  %v1205_v10 = vpack.c.bf16 %v1658_v34, %v1646_v29 }
  0x4c   : > { %v335_v44 = vadd.f32 %v334_v37, %v1637_v26  ;;  %v286_v45 = vadd.f32 %v285_v35, %v1652_v32  ;;  %v319_v54 = vadd.f32 %v318_v43, %v1686_v50  ;;  %v1702_v58 = vld [vmem:[%s1558_s23 + $0x1a8] sm:$0xff]  ;;  %v1709_v63 = vld [vmem:[%s1558_s23 + $0x130] sm:$0xff]  ;;  %v1715_v1 = vld [vmem:[%s1558_s23 + $0x40] sm:$0xff]  ;;  %v1213_v19 = vpack.c.bf16 %v1692_v52, %v1681_v48 }
  0x4d   : > { %v303_v47 = vadd.f32 %v302_v40, %v1655_v33  ;;  %v1712_v0 = vld [vmem:[%s1558_s23 + $0x1b0] sm:$0xff]  ;;  %v1720_v7 = vld [vmem:[%s1558_s23 + $0xc0] sm:$0xff]  ;;  %v1726_v11 = vld [vmem:[%s1558_s23 + $0x138] sm:$0xff]  ;;  %v1207_v31 = vpack.c.bf16 %v1702_v58, %v1699_v57 }
  0x4e   : > { %v287_v53 = vadd.f32 %v286_v45, %v1681_v48  ;;  %v336_v55 = vadd.f32 %v335_v44, %v1689_v51  ;;  %v320_v60 = vadd.f32 %v319_v54, %v1699_v57  ;;  %v1729_v14 = vld [vmem:[%s1558_s23 + $0x1b8] sm:$0xff]  ;;  %v1732_v15 = vld [vmem:[%s1558_s23 + $0x48] sm:$0xff]  ;;  %v1747_v36 = vld [vmem:[%s1558_s23 + $0x50] sm:$0xff] }
  0x4f   : > { %v304_v56 = vadd.f32 %v303_v47, %v1692_v52  ;;  %v1740_v25 = vld [vmem:[%s1558_s23 + $0xc8] sm:$0xff]  ;;  %v1750_v37 = vld [vmem:[%s1558_s23 + $0x140] sm:$0xff] }
  0x50   : > { %1194 = vmatpush1.bf16.xpose.msra.mxu0 %v1193_v41  ;;  %v288_v59 = vadd.f32 %v287_v53, %v1664_v38  ;;  %v337_v61 = vadd.f32 %v336_v55, %v1702_v58  ;;  %v321_v4 = vadd.f32 %v320_v60, %v1709_v63  ;;  %v1753_v40 = vld [vmem:[%s1558_s23 + $0x1c0] sm:$0xff]  ;;  %v1215_v41 = vpack.c.bf16 %v1729_v14, %v1726_v11  ;;  %v1767_v47 = vld [vmem:[%s1558_s23 + $0x148] sm:$0xff]  ;;  %v1777_v53 = vld [vmem:[%s1558_s23 + $0xd8] sm:$0xff] }
  0x51   : > { %1202 = vmatpush1.bf16.xpose.msra.mxu1 %v1201_v42  ;;  %1204 = vmatprep.subr.bf16.mxu0 %v1203_v46  ;;  %v305_v62 = vadd.f32 %v304_v56, %v1667_v39  ;;  %v1759_v42 = vld [vmem:[%s1558_s23 + $0xd0] sm:$0xff] }
  0x52   : > { %1212 = vmatprep.subr.bf16.mxu1 %v1211_v49  ;;  %v338_v6 = vadd.f32 %v337_v61, %v1712_v0  ;;  %v289_v9 = vadd.f32 %v288_v59, %v1715_v1  ;;  %v322_v23 = vadd.f32 %v321_v4, %v1726_v11  ;;  %v1774_v49 = vld [vmem:[%s1558_s23 + $0x58] sm:$0xff]  ;;  %v1784_v56 = vld [vmem:[%s1558_s23 + $0x1d0] sm:$0xff]  ;;  %v1793_v61 = vld [vmem:[%s1558_s23 + $0x60] sm:$0xff] }
  0x53   : > { %v306_v18 = vadd.f32 %v305_v62, %v1720_v7  ;;  %v1209_v62 = vpack.c.bf16 %v1689_v51, %v1686_v50  ;;  %v1801_v4 = vld [vmem:[%s1558_s23 + $0x158] sm:$0xff] }
  0x54   : > { %v339_v24 = vadd.f32 %v338_v6, %v1729_v14  ;;  %v290_v30 = vadd.f32 %v289_v9, %v1732_v15  ;;  %v323_v43 = vadd.f32 %v322_v23, %v1750_v37  ;;  %v1807_v6 = vld [vmem:[%s1558_s23 + $0xe0] sm:$0xff]  ;;  %v1219_v23 = vpack.c.bf16 %v1740_v25, %v1732_v15 }
  0x55   : > { %v307_v35 = vadd.f32 %v306_v18, %v1740_v25 }
  0x56   : > { %v340_v44 = vadd.f32 %v339_v24, %v1753_v40  ;;  %v291_v45 = vadd.f32 %v290_v30, %v1747_v36  ;;  %v324_v54 = vadd.f32 %v323_v43, %v1767_v47  ;;  %v1822_v24 = vld [vmem:[%s1558_s23 + $0x160] sm:$0xff] }
  0x57   : > { %428 = vmatmul.mubr.f32.vlgmr.msra.gmra.mrb[0].mxu0 %v1589_v3  ;;  %v308_v46 = vadd.f32 %v307_v35, %v1759_v42  ;;  %v1770_v3 = vld [vmem:[%s1558_s23 + $0x1c8] sm:$0xff]  ;;  %v1832_v35 = vld [vmem:[%s1558_s23 + $0x70] sm:$0xff] }
  0x58   : > { %513 = vmatmul.mubr.f32.vlgmr.msra.gmra.mrb[0].mxu1 %v1606_v12  ;;  %1206 = vmatpush1.bf16.xpose.msra.mxu0 %v1205_v10  ;;  %v341_v12 = vadd.f32 %v340_v44, %v1770_v3  ;;  %v292_v59 = vadd.f32 %v291_v45, %v1774_v49  ;;  %v1217_v10 = vpack.c.bf16 %v1712_v0, %v1709_v63  ;;  %v1838_v44 = vld [vmem:[%s1558_s23 + $0xe8] sm:$0xff] }
  0x59   : > { %432 = vmatprep.mubr.f32.mxu0 %v1586_v2  ;;  %1214 = vmatpush1.bf16.xpose.msra.mxu1 %v1213_v19  ;;  %v309_v55 = vadd.f32 %v308_v46, %v1777_v53  ;;  %v1787_v2 = vld [vmem:[%s1558_s23 + $0x150] sm:$0xff]  ;;  %v1841_v45 = vld [vmem:[%s1558_s23 + $0x168] sm:$0xff] }
  0x5a   : > { %517 = vmatprep.mubr.f32.mxu1 %v1598_v8  ;;  %1208 = vmatprep.subr.bf16.mxu0 %v1207_v31  ;;  %v342_v60 = vadd.f32 %v341_v12, %v1784_v56  ;;  %v325_v8 = vadd.f32 %v324_v54, %v1787_v2  ;;  %v293_v9 = vadd.f32 %v292_v59, %v1793_v61  ;;  %v1849_v54 = vld [vmem:[%s1558_s23 + $0x1e8] sm:$0xff] }
  0x5b   : > { %433 = vmatmul.mubr.f32.gmra.mrb[2].mxu0 %v1593_v5  ;;  %1216 = vmatprep.subr.bf16.mxu1 %v1215_v41  ;;  %v1804_v5 = vld [vmem:[%s1558_s23 + $0x1d8] sm:$0xff]  ;;  %v310_v18 = vadd.f32 %v309_v55, %v1807_v6  ;;  %v1227_v31 = vpack.c.bf16 %v1777_v53, %v1774_v49  ;;  %v1855_v55 = vld [vmem:[%s1558_s23 + $0x170] sm:$0xff] }
  0x5c   : > { %518 = vmatmul.mubr.f32.gmra.mrb[2].mxu1 %v1609_v13  ;;  %437 = vmatprep.mubr.f32.mxu0 %v1615_v16  ;;  %v343_v13 = vadd.f32 %v342_v60, %v1804_v5  ;;  %v1815_v16 = vld [vmem:[%s1558_s23 + $0x68] sm:$0xff]  ;;  %v326_v19 = vadd.f32 %v325_v8, %v1801_v4  ;;  %v1221_v8 = vpack.c.bf16 %v1720_v7, %v1715_v1 }
  0x5d   : > { %522 = vmatprep.mubr.f32.mxu1 %v1630_v22  ;;  %v1825_v22 = vld [vmem:[%s1558_s23 + $0x1e0] sm:$0xff]  ;;  %v294_v30 = vadd.f32 %v293_v9, %v1815_v16  ;;  %v311_v12 = vadd.f32 %v310_v18, %v1838_v44  ;;  %v1875_v9 = vld [vmem:[%s1558_s23 + $0x1f0] sm:$0xff]  ;;  %v245_v18 = vld [vmem:[%s1558_s23 + $0xf8] sm:$0xff] }
  0x5e   : > { %v327_v41 = vadd.f32 %v326_v19, %v1822_v24  ;;  %v344_v43 = vadd.f32 %v343_v13, %v1825_v22  ;;  %v1889_v19 = vld [vmem:[%s1558_s23 + $0x1f8] sm:$0xff] }
  0x5f   : > { %438 = vmatmul.mubr.f32.gmra.mrb[4].mxu0 %v1624_v20  ;;  %v295_v46 = vadd.f32 %v294_v30, %v1832_v35  ;;  %v1846_v20 = vld [vmem:[%s1558_s23 + $0x78] sm:$0xff] }
  0x60   : > { %523 = vmatmul.mubr.f32.gmra.mrb[4].mxu1 %v1640_v27  ;;  %1210 = vmatpush1.bf16.xpose.msra.mxu0 %v1209_v62  ;;  %v328_v27 = vadd.f32 %v327_v41, %v1841_v45  ;;  %v1869_v62 = vld [vmem:[%s1558_s23 + $0x178] sm:$0xff] }
  0x61   : > { %442 = vmatprep.mubr.f32.mxu0 %v1618_v17  ;;  %1218 = vmatpush1.bf16.xpose.msra.mxu1 %v1217_v10  ;;  %v296_v59 = vadd.f32 %v295_v46, %v1846_v20  ;;  %v345_v17 = vadd.f32 %v344_v43, %v1849_v54  ;;  %v1223_v10 = vpack.c.bf16 %v1770_v3, %v1767_v47 }
  0x62   : > { %527 = vmatprep.mubr.f32.mxu1 %v1637_v26  ;;  %1220 = vmatprep.subr.bf16.mxu0 %v1219_v23  ;;  %v329_v60 = vadd.f32 %v328_v27, %v1855_v55  ;;  %v1866_v26 = vld [vmem:[%s1558_s23 + $0xf0] sm:$0xff] }
  0x63   : > { %443 = vmatmul.mubr.f32.gmra.mrb[6].mxu0 %v1627_v21  ;;  %1228 = vmatprep.subr.bf16.mxu1 %v1227_v31  ;;  %v1229_v21 = vpack.c.bf16 %v1759_v42, %v1747_v36  ;;  %v346_v13 = vadd.f32 %v345_v17, %v1875_v9 }
  0x64   : > { %528 = vmatmul.mubr.f32.gmra.mrb[6].mxu1 %v1643_v28  ;;  %597 = vmatprep.mubr.f32.mxu0 %v1652_v32  ;;  %v312_v28 = vadd.f32 %v311_v12, %v1866_v26  ;;  %v330_v32 = vadd.f32 %v329_v60, %v1869_v62 }
  0x65   : > { %682 = vmatprep.mubr.f32.mxu1 %v1664_v38  ;;  %297 = vadd.xlane.f32.xlu0 %v296_v59  ;;  %v1231_v38 = vpack.c.bf16 %v1804_v5, %v1801_v4  ;;  %v347_v30 = vadd.f32 %v346_v13, %v1889_v19 }
  0x66   : > { %331 = vadd.xlane.f32.xlu1 %v330_v32  ;;  %v313_v23 = vadd.f32 %v312_v28, %v245_v18 }
  0x67   : > { %598 = vmatmul.mubr.f32.vlgmr.msra.gmra.mrb[8].mxu0 %v1646_v29  ;;  %v1225_v29 = vpack.c.bf16 %v1753_v40, %v1750_v37 }
  0x68   : > { %1222 = vmatpush1.bf16.xpose.msra.mxu0 %v1221_v8  ;;  %683 = vmatmul.mubr.f32.vlgmr.msra.gmra.mrb[8].mxu1 %v1681_v48  ;;  %v1237_v48 = vpack.c.bf16 %v1807_v6, %v1793_v61 }
  0x69   : > { %602 = vmatprep.mubr.f32.mxu0 %v1655_v33  ;;  %1230 = vmatpush1.bf16.xpose.msra.mxu1 %v1229_v21  ;;  %v1233_v33 = vpack.c.bf16 %v1784_v56, %v1787_v2 }
  0x6a   : > { %687 = vmatprep.mubr.f32.mxu1 %v1667_v39  ;;  %1224 = vmatprep.subr.bf16.mxu0 %v1223_v10  ;;  %v1235_v39 = vpack.c.bf16 %v1838_v44, %v1815_v16 }
  0x6b   : > { %603 = vmatmul.mubr.f32.gmra.mrb[10].mxu0 %v1658_v34  ;;  %1232 = vmatprep.subr.bf16.mxu1 %v1231_v38  ;;  %v1243_v34 = vpack.c.bf16 %v245_v18, %v1846_v20 }
  0x6c   : > { %688 = vmatmul.mubr.f32.gmra.mrb[10].mxu1 %v1692_v52  ;;  %607 = vmatprep.mubr.f32.mxu0 %v1699_v57  ;;  %v1239_v52 = vpack.c.bf16 %v1849_v54, %v1841_v45  ;;  %v1241_v57 = vpack.c.bf16 %v1825_v22, %v1822_v24 }
  0x6d   : > { %692 = vmatprep.mubr.f32.mxu1 %v1726_v11  ;;  %314 = vadd.xlane.f32.xlu0 %v313_v23  ;;  %v281_v11 = vld [vmem:[%s1568_s17 + $0x18] sm:$0xff] }
  0x6e   : > { %348 = vadd.xlane.f32.xlu1 %v347_v30 }
  0x6f   : > { %608 = vmatmul.mubr.f32.gmra.mrb[12].mxu0 %v1686_v50  ;;  %v1245_v50 = vpack.c.bf16 %v1866_v26, %v1832_v35 }
  0x70   : > { %1226 = vmatpush1.bf16.xpose.msra.mxu0 %v1225_v29  ;;  %693 = vmatmul.mubr.f32.gmra.mrb[12].mxu1 %v1709_v63  ;;  %v278_v63 = vld [vmem:[%s1568_s17] sm:$0xff] }
  0x71   : > { %612 = vmatprep.mubr.f32.mxu0 %v1702_v58  ;;  %1234 = vmatpush1.bf16.xpose.msra.mxu1 %v1233_v33  ;;  %v1249_v58 = vpack.c.bf16 %v1875_v9, %v1855_v55 }
  0x72   : > { %697 = vmatprep.mubr.f32.mxu1 %v1729_v14  ;;  %1236 = vmatprep.subr.bf16.mxu0 %v1235_v39 }
  0x73   : > { %613 = vmatmul.mubr.f32.gmra.mrb[14].mxu0 %v1689_v51  ;;  %1244 = vmatprep.subr.bf16.mxu1 %v1243_v34  ;;  %v1247_v51 = vpack.c.bf16 %v1889_v19, %v1869_v62 }
  0x74   : > { %698 = vmatmul.mubr.f32.gmra.mrb[14].mxu1 %v1712_v0  ;;  %767 = vmatprep.mubr.f32.mxu0 %v1732_v15 }
  0x75   : > { %852 = vmatprep.mubr.f32.mxu1 %v1774_v49 }
  0x77   : > { %768 = vmatmul.mubr.f32.vlgmr.msra.gmra.mrb[16].mxu0 %v1715_v1  ;;  %v279_v1 = vld [vmem:[%s1568_s17 + $0x8] sm:$0xff] }
  0x78   : > { %1238 = vmatpush1.bf16.xpose.msra.mxu0 %v1237_v48  ;;  %853 = vmatmul.mubr.f32.vlgmr.msra.gmra.mrb[16].mxu1 %v1747_v36 }
  0x79   : > { %772 = vmatprep.mubr.f32.mxu0 %v1740_v25  ;;  %1246 = vmatpush1.bf16.xpose.msra.mxu1 %v1245_v50 }
  0x7a   : > { %857 = vmatprep.mubr.f32.mxu1 %v1777_v53  ;;  %1240 = vmatprep.subr.bf16.mxu0 %v1239_v52 }
  0x7b   : > { %773 = vmatmul.mubr.f32.gmra.mrb[18].mxu0 %v1720_v7  ;;  %1248 = vmatprep.subr.bf16.mxu1 %v1247_v51  ;;  %v280_v7 = vld [vmem:[%s1568_s17 + $0x10] sm:$0xff] }
  0x7c   : > { %858 = vmatmul.mubr.f32.gmra.mrb[18].mxu1 %v1759_v42  ;;  %777 = vmatprep.mubr.f32.mxu0 %v1767_v47 }
  0x7d   : > { %862 = vmatprep.mubr.f32.mxu1 %v1801_v4 }
  0x7f   : > { %778 = vmatmul.mubr.f32.gmra.mrb[20].mxu0 %v1750_v37 }
  0x80   : > { %1242 = vmatpush1.bf16.xpose.msra.mxu0 %v1241_v57  ;;  %863 = vmatmul.mubr.f32.gmra.mrb[20].mxu1 %v1787_v2 }
  0x81   : > { %782 = vmatprep.mubr.f32.mxu0 %v1770_v3  ;;  %1250 = vmatpush1.bf16.xpose.msra.mxu1 %v1249_v58 }
  0x82   : > { %867 = vmatprep.mubr.f32.mxu1 %v1804_v5 }
  0x83   : > { %783 = vmatmul.mubr.f32.gmra.mrb[22].mxu0 %v1753_v40 }
  0x84   : > { %868 = vmatmul.mubr.f32.gmra.mrb[22].mxu1 %v1784_v56  ;;  %937 = vmatprep.mubr.f32.mxu0 %v1815_v16 }
  0x85   : > { %1022 = vmatprep.mubr.f32.mxu1 %v1846_v20 }
  0x87   : > { %938 = vmatmul.mubr.f32.vlgmr.msra.gmra.mrb[24].mxu0 %v1793_v61 }
  0x88   : > { %1023 = vmatmul.mubr.f32.vlgmr.msra.gmra.mrb[24].mxu1 %v1832_v35  ;;  %942 = vmatprep.mubr.f32.mxu0 %v1838_v44 }
  0x89   : > { %1027 = vmatprep.mubr.f32.mxu1 %v245_v18 }
  0x8b   : > { %943 = vmatmul.mubr.f32.gmra.mrb[26].mxu0 %v1807_v6 }
  0x8c   : > { %1028 = vmatmul.mubr.f32.gmra.mrb[26].mxu1 %v1866_v26  ;;  %947 = vmatprep.mubr.f32.mxu0 %v1841_v45 }
  0x8d   : > { %1032 = vmatprep.mubr.f32.mxu1 %v1869_v62 }
  0x8f   : > { %948 = vmatmul.mubr.f32.gmra.mrb[28].mxu0 %v1822_v24 }
  0x90   : > { %1033 = vmatmul.mubr.f32.gmra.mrb[28].mxu1 %v1855_v55  ;;  %952 = vmatprep.mubr.f32.mxu0 %v1849_v54 }
  0x91   : > { %1037 = vmatprep.mubr.f32.mxu1 %v1889_v19 }
  0x93   : > { %953 = vmatmul.mubr.f32.gmra.mrb[30].mxu0 %v1825_v22 }
  0x94   : > { %1038 = vmatmul.mubr.f32.gmra.mrb[30].mxu1 %v1875_v9 }
  0xf2   : > { %v298_v0 = vpop.xlane.xlu0 %297 }
  0xf3   : > { %v350_v14 = vadd.f32 %v298_v0, %v278_v63  ;;  %v332_v15 = vpop.xlane.xlu1 %331 }
  0xf4   : > { %v352_v36 = vadd.f32 %v332_v15, %v280_v7 }
  0xf5   : > { %355 = vst.msk [vmem:[%s1568_s17] sm:$0xff] %vm354_vm2, %v350_v14 }
  0xf6   : > { %357 = vst.msk [vmem:[%s1568_s17 + $0x10] sm:$0xff] %vm354_vm2, %v352_v36 }
  0xfa   : > { %v315_v25 = vpop.xlane.xlu0 %314 }
  0xfb   : > { %v351_v37 = vadd.f32 %v315_v25, %v279_v1  ;;  %v349_v40 = vpop.xlane.xlu1 %348 }
  0xfc   : > { %v353_v42 = vadd.f32 %v349_v40, %v281_v11 }
  0xfd   : > { %356 = vst.msk [vmem:[%s1568_s17 + $0x8] sm:$0xff] %vm354_vm2, %v351_v37 }
  0xfe   : > { %358 = vst.msk [vmem:[%s1568_s17 + $0x18] sm:$0xff] %vm354_vm2, %v353_v42 }
 0x12a   : > { %v429_v47 = vpop.f32.mrb[0].mxu0 }
 0x12b   : > { %v431_v3 = vpop.f32.mrb[1].mxu0  ;;  %v514_v49 = vpop.f32.mrb[0].mxu1 }
 0x12c   : > { %v515_v53 = vadd.f32 %v514_v49, %v429_v47  ;;  %v516_v56 = vpop.f32.mrb[1].mxu1 }
 0x12e   : > { %v434_v2 = vpop.f32.mrb[2].mxu0 }
 0x12f   : > { %v436_v61 = vpop.f32.mrb[3].mxu0  ;;  %v519_v4 = vpop.f32.mrb[2].mxu1 }
 0x130   : > { %v520_v5 = vadd.f32 %v519_v4, %v434_v2  ;;  %v521_v6 = vpop.f32.mrb[3].mxu1 }
 0x132   : > { %v439_v16 = vpop.f32.mrb[4].mxu0 }
 0x133   : > { %v441_v24 = vpop.f32.mrb[5].mxu0  ;;  %v524_v22 = vpop.f32.mrb[4].mxu1 }
 0x134   : > { %v525_v31 = vadd.f32 %v524_v22, %v439_v16  ;;  %v526_v35 = vpop.f32.mrb[5].mxu1  ;;  %v360_v22 = vld [vmem:[%s1573_s28 + $0x8] sm:$0xff] }
 0x135   : > { %v362_v35 = vld [vmem:[%s1573_s28 + $0x18] sm:$0xff] }
 0x136   : > { %v444_v41 = vpop.f32.mrb[6].mxu0 }
 0x137   : > { %v446_v43 = vpop.f32.mrb[7].mxu0  ;;  %v529_v44 = vpop.f32.mrb[6].mxu1 }
 0x138   : > { %v530_v45 = vadd.f32 %v529_v44, %v444_v41  ;;  %v531_v46 = vpop.f32.mrb[7].mxu1 }
 0x13a   : > { %v599_v20 = vpop.f32.mrb[8].mxu0 }
 0x13b   : > { %v600_v54 = vadd.f32 %v599_v20, %v515_v53  ;;  %v601_v12 = vpop.f32.mrb[9].mxu0  ;;  %v684_v27 = vpop.f32.mrb[8].mxu1 }
 0x13c   : > { %v686_v55 = vpop.f32.mrb[9].mxu1 }
 0x13d   : > { %v685_v59 = vadd.f32 %v684_v27, %v600_v54 }
 0x13e   : > { %v604_v17 = vpop.f32.mrb[10].mxu0 }
 0x13f   : > { %v605_v60 = vadd.f32 %v604_v17, %v520_v5  ;;  %v606_v8 = vpop.f32.mrb[11].mxu0  ;;  %v689_v26 = vpop.f32.mrb[10].mxu1  ;;  %v359_v5 = vld [vmem:[%s1573_s28] sm:$0xff] }
 0x140   : > { %v691_v62 = vpop.f32.mrb[11].mxu1 }
 0x141   : > { %v690_v21 = vadd.f32 %v689_v26, %v605_v60 }
 0x142   : > { %v609_v9 = vpop.f32.mrb[12].mxu0 }
 0x143   : > { %v610_v28 = vadd.f32 %v609_v9, %v525_v31  ;;  %v611_v32 = vpop.f32.mrb[13].mxu0  ;;  %v694_v10 = vpop.f32.mrb[12].mxu1  ;;  %v361_v31 = vld [vmem:[%s1573_s28 + $0x10] sm:$0xff] }
 0x144   : > { %v696_v13 = vpop.f32.mrb[13].mxu1 }
 0x145   : > { %v695_v38 = vadd.f32 %v694_v10, %v610_v28 }
 0x146   : > { %v614_v18 = vpop.f32.mrb[14].mxu0 }
 0x147   : > { %v615_v19 = vadd.f32 %v614_v18, %v530_v45  ;;  %v616_v23 = vpop.f32.mrb[15].mxu0  ;;  %v699_v30 = vpop.f32.mrb[14].mxu1 }
 0x148   : > { %v701_v29 = vpop.f32.mrb[15].mxu1 }
 0x149   : > { %v700_v33 = vadd.f32 %v699_v30, %v615_v19 }
 0x14a   : > { %v769_v39 = vpop.f32.mrb[16].mxu0 }
 0x14b   : > { %v770_v34 = vadd.f32 %v769_v39, %v685_v59  ;;  %v771_v48 = vpop.f32.mrb[17].mxu0  ;;  %v854_v50 = vpop.f32.mrb[16].mxu1 }
 0x14c   : > { %v856_v52 = vpop.f32.mrb[17].mxu1 }
 0x14d   : > { %v855_v51 = vadd.f32 %v854_v50, %v770_v34 }
 0x14e   : > { %v774_v57 = vpop.f32.mrb[18].mxu0 }
 0x14f   : > { %v775_v58 = vadd.f32 %v774_v57, %v690_v21  ;;  %v776_v63 = vpop.f32.mrb[19].mxu0  ;;  %v859_v0 = vpop.f32.mrb[18].mxu1 }
 0x150   : > { %v861_v1 = vpop.f32.mrb[19].mxu1 }
 0x151   : > { %v860_v7 = vadd.f32 %v859_v0, %v775_v58 }
 0x152   : > { %v779_v11 = vpop.f32.mrb[20].mxu0 }
 0x153   : > { %v780_v14 = vadd.f32 %v779_v11, %v695_v38  ;;  %v781_v15 = vpop.f32.mrb[21].mxu0  ;;  %v864_v25 = vpop.f32.mrb[20].mxu1 }
 0x154   : > { %v866_v36 = vpop.f32.mrb[21].mxu1 }
 0x155   : > { %v865_v37 = vadd.f32 %v864_v25, %v780_v14 }
 0x156   : > { %v784_v40 = vpop.f32.mrb[22].mxu0 }
 0x157   : > { %v785_v42 = vadd.f32 %v784_v40, %v700_v33  ;;  %v786_v47 = vpop.f32.mrb[23].mxu0  ;;  %v869_v3 = vpop.f32.mrb[22].mxu1 }
 0x158   : > { %v871_v49 = vpop.f32.mrb[23].mxu1 }
 0x159   : > { %v870_v53 = vadd.f32 %v869_v3, %v785_v42 }
 0x15a   : > { %v939_v56 = vpop.f32.mrb[24].mxu0 }
 0x15b   : > { %v940_v2 = vadd.f32 %v939_v56, %v855_v51  ;;  %v941_v61 = vpop.f32.mrb[25].mxu0  ;;  %v1024_v4 = vpop.f32.mrb[24].mxu1 }
 0x15c   : > { %v1026_v6 = vpop.f32.mrb[25].mxu1 }
 0x15d   : > { %v1025_v16 = vadd.f32 %v1024_v4, %v940_v2 }
 0x15e   : > { %v944_v24 = vpop.f32.mrb[26].mxu0 }
 0x15f   : > { %v1043_v41 = vadd.f32 %v1025_v16, %v359_v5  ;;  %v945_v43 = vadd.f32 %v944_v24, %v860_v7  ;;  %v946_v44 = vpop.f32.mrb[27].mxu0  ;;  %v1029_v45 = vpop.f32.mrb[26].mxu1 }
 0x160   : > { %v1031_v46 = vpop.f32.mrb[27].mxu1 }
 0x161   : > { %v1030_v20 = vadd.f32 %v1029_v45, %v945_v43  ;;  %1048 = vst.msk [vmem:[%s1573_s28] sm:$0xff] %vm1047_vm3, %v1043_v41 }
 0x162   : > { %v949_v54 = vpop.f32.mrb[28].mxu0 }
 0x163   : > { %v1044_v12 = vadd.f32 %v1030_v20, %v360_v22  ;;  %v950_v27 = vadd.f32 %v949_v54, %v865_v37  ;;  %v951_v55 = vpop.f32.mrb[29].mxu0  ;;  %v1034_v59 = vpop.f32.mrb[28].mxu1 }
 0x164   : > { %v1036_v17 = vpop.f32.mrb[29].mxu1 }
 0x165   : > { %v1035_v60 = vadd.f32 %v1034_v59, %v950_v27  ;;  %1049 = vst.msk [vmem:[%s1573_s28 + $0x8] sm:$0xff] %vm1047_vm3, %v1044_v12 }
 0x166   : > { %v954_v8 = vpop.f32.mrb[30].mxu0 }
 0x167   : > { %v1045_v26 = vadd.f32 %v1035_v60, %v361_v31  ;;  %v955_v62 = vadd.f32 %v954_v8, %v870_v53  ;;  %v956_v21 = vpop.f32.mrb[31].mxu0  ;;  %v1039_v9 = vpop.f32.mrb[30].mxu1 }
 0x168   : > { %v1041_v28 = vpop.f32.mrb[31].mxu1 }
 0x169   : > { %v1040_v32 = vadd.f32 %v1039_v9, %v955_v62  ;;  %1050 = vst.msk [vmem:[%s1573_s28 + $0x10] sm:$0xff] %vm1047_vm3, %v1045_v26 }
 0x16b   : > { %v1046_v10 = vadd.f32 %v1040_v32, %v362_v35 }
 0x16d   : > { %1051 = vst.msk [vmem:[%s1573_s28 + $0x18] sm:$0xff] %vm1047_vm3, %v1046_v10 }
 0x16e PF: > { %s16_s16 = sadd.s32 1, %s1422_s16   ;;  %s2004_s9 = smov %s1398_s10 }
 0x16f   : > { %p13_p7 = scmp.ge.s32.totalorder %s16_s16, 6   ;;  %s2005_s10 = smov %s1402_s11 }
 0x170   : > { %s2006_s11 = smov %s1510_s3  ;;  %s2007_s12 = smov %s1414_s14 }
 0x171   : > { %s2008_s13 = smov %s1418_s15  ;;  %s2009_s14 = smov %s2012_s18 }
 0x172   : > { %s2010_s15 = smov %s2016_s19  ;;  %15 = sbr.rel (!%p13_p7) target bundleno = 5 (0x5), region = 80 }
 0x179   :  { %1091 = vsyncpa [#allocation3], 1 }
 0x17a   :  { %1093 = vsyncpa [#allocation3 + $0x1], 1 }

</bundles_post_ra>
